<compile_context>
chip_gen: v6e
topology: v6e:2x2x1
jax: 0.10.0
libtpu: 0.0.40
codegen_flags: <defaults>
</compile_context>

<pallas_src>
import functools
import math

import jax
import jax.numpy as jnp
from jax import lax
from jax.experimental import pallas as pl
from jax.experimental.pallas import tpu as pltpu


def _round_up(x, m):
    return ((x + m - 1) // m) * m


# ---------------------------------------------------------------------------
# Path A: one-hot matmul with the table resident in VMEM.
# ---------------------------------------------------------------------------
def _onehot_kernel(ids_ref, table_ref, out_ref, *, vocab, scale):
    # ids_ref:   (T, 1)      int32   — token ids for this tile
    # table_ref: (vocab, D)  table dtype — full table, constant across grid
    # out_ref:   (T, D)
    ids = ids_ref[...]                                              # (T, 1)
    vocab_iota = lax.broadcasted_iota(jnp.int32, (1, vocab), 1)     # (1, vocab)
    one_hot = (ids == vocab_iota).astype(table_ref.dtype)           # (T, vocab)
    emb = jnp.dot(one_hot, table_ref[...],
                  preferred_element_type=jnp.float32)               # (T, D)
    out_ref[...] = (emb * scale).astype(out_ref.dtype)


def _onehot_forward(ids_pad, table, *, tile, scale, single_buffer_table):
    n_pad = ids_pad.shape[0]
    vocab, d_model = table.shape
    itemsize = table.dtype.itemsize

    table_spec_kwargs = {}
    if single_buffer_table:
        # Constant index_map -> double-buffering the table is pure VMEM waste.
        table_spec_kwargs["pipeline_mode"] = pl.Buffered(1)
    table_spec = pl.BlockSpec((vocab, d_model), lambda i: (0, 0),
                              **table_spec_kwargs)

    table_bytes = vocab * d_model * itemsize * (1 if single_buffer_table else 2)
    tile_bytes = tile * (d_model * itemsize + 4)   # out tile + ids tile
    vmem_limit = int(min(64 << 20,
                         max(16 << 20, table_bytes + 2 * tile_bytes + (4 << 20))))

    kernel = functools.partial(_onehot_kernel, vocab=vocab, scale=scale)
    return pl.pallas_call(
        kernel,
        out_shape=jax.ShapeDtypeStruct((n_pad, d_model), table.dtype),
        grid_spec=pltpu.PrefetchScalarGridSpec(
            num_scalar_prefetch=0,
            grid=(n_pad // tile,),
            in_specs=[
                pl.BlockSpec((tile, 1), lambda i: (i, 0)),   # ids tile
                table_spec,                                  # full table (resident)
            ],
            out_specs=pl.BlockSpec((tile, d_model), lambda i: (i, 0)),
        ),
        compiler_params=pltpu.CompilerParams(
            dimension_semantics=("parallel",),
            vmem_limit_bytes=vmem_limit),
    )(ids_pad.reshape(n_pad, 1), table)


# ---------------------------------------------------------------------------
# Path B: HBM row-gather with scalar-prefetched ids (large vocab).
# ---------------------------------------------------------------------------
def _gather_kernel(ids_ref, table_hbm, out_ref, buf, sems, *, tile, scale):
    # ids_ref:   (n_pad,) int32 in SMEM (scalar-prefetched)
    # table_hbm: (vocab, D) ref left in HBM (memory_space=pl.ANY)
    # out_ref:   (tile, D)
    # buf:       (tile, D) VMEM scratch, sems: (tile,) DMA semaphores
    base = pl.program_id(0) * tile

    @pl.loop(0, tile)
    def _start(t):
        row = ids_ref[base + t]
        pltpu.make_async_copy(table_hbm.at[pl.ds(row, 1)],
                              buf.at[pl.ds(t, 1)],
                              sems.at[t]).start()

    @pl.loop(0, tile)
    def _wait(t):
        pltpu.make_async_copy(table_hbm.at[pl.ds(0, 1)],
                              buf.at[pl.ds(t, 1)],
                              sems.at[t]).wait()

    out_ref[...] = (buf[...] * scale).astype(out_ref.dtype)


def _gather_forward(ids_pad, table, *, tile, scale):
    n_pad = ids_pad.shape[0]
    vocab, d_model = table.shape
    itemsize = table.dtype.itemsize
    vmem_limit = int(min(64 << 20,
                         max(16 << 20, 3 * tile * d_model * itemsize + (4 << 20))))

    kernel = functools.partial(_gather_kernel, tile=tile, scale=scale)
    return pl.pallas_call(
        kernel,
        out_shape=jax.ShapeDtypeStruct((n_pad, d_model), table.dtype),
        grid_spec=pltpu.PrefetchScalarGridSpec(
            num_scalar_prefetch=1,
            grid=(n_pad // tile,),
            in_specs=[pl.BlockSpec(memory_space=pl.ANY)],   # table stays in HBM
            out_specs=pl.BlockSpec((tile, d_model), lambda i, ids: (i, 0)),
            scratch_shapes=[
                pltpu.VMEM((tile, d_model), table.dtype),
                pltpu.SemaphoreType.DMA((tile,)),
            ],
        ),
        compiler_params=pltpu.CompilerParams(
            dimension_semantics=("arbitrary",),
            vmem_limit_bytes=vmem_limit),
    )(ids_pad, table)


# ---------------------------------------------------------------------------
# Wrapper: Embeddings.forward
# ---------------------------------------------------------------------------
def embeddings_forward(x, table, *, tile_tokens=256, force_gather=False):
    """x: int token ids (any shape); table: [vocab, d_model].

    Returns table[x] * sqrt(d_model) with shape x.shape + (d_model,).
    """
    vocab, d_model = table.shape
    lead = x.shape
    n_tok = int(math.prod(lead)) if lead else 1
    scale = math.sqrt(d_model)

    table_bytes = vocab * d_model * table.dtype.itemsize
    # Keep the resident-table one-hot path only while the table comfortably
    # fits VMEM (v7x scoped default is 32 MiB); otherwise use the HBM gather.
    use_gather = force_gather or table_bytes > (24 << 20)

    if use_gather:
        # Cap outstanding row-DMAs per grid step.
        tile = max(8, min(_round_up(min(tile_tokens, 128), 8), _round_up(n_tok, 8)))
    else:
        # Big token tile: fills the MXU M-dim and amortizes per-step overhead;
        # clamped so small demo inputs don't pad all the way to 256.
        tile = max(8, min(_round_up(tile_tokens, 8), _round_up(n_tok, 8)))

    n_pad = _round_up(n_tok, tile)
    ids = x.reshape(-1).astype(jnp.int32)
    if n_pad != n_tok:
        ids = jnp.pad(ids, (0, n_pad - n_tok))   # pad ids are 0 (a valid row)

    if use_gather:
        out_flat = _gather_forward(ids, table, tile=tile, scale=scale)
    else:
        try:
            out_flat = _onehot_forward(ids, table, tile=tile, scale=scale,
                                       single_buffer_table=True)
        except Exception:
            # Fallback if pl.Buffered(1) is unsupported on this jax version.
            out_flat = _onehot_forward(ids, table, tile=tile, scale=scale,
                                       single_buffer_table=False)

    out_flat = out_flat[:n_tok]
    return out_flat.reshape(*lead, d_model)


if __name__ == "__main__":
    key = jax.random.PRNGKey(0)
    k_tab, k_ids, k_tab2, k_ids2 = jax.random.split(key, 4)

    # --- Config 1: small shapes from the module spec; exercises the one-hot
    #     (resident table / MXU) path.  NOTE: d_model=32 < 128 means masked
    #     output stores here; real models use d_model >= 128 (lane-dense).
    vocab, d_model, B, S = 64, 32, 2, 8
    table = jax.random.normal(k_tab, (vocab, d_model), dtype=jnp.float32)
    x = jax.random.randint(k_ids, (B, S), 0, vocab, dtype=jnp.int32)

    out = jax.block_until_ready(embeddings_forward(x, table))
    ref = jnp.take(table, x, axis=0) * math.sqrt(d_model)
    assert out.shape == (B, S, d_model)
    assert jnp.allclose(out, ref, atol=1e-5, rtol=1e-5)

    # --- Config 2: exercise the large-vocab HBM row-gather path at small
    #     scale (forced), with a lane-dense d_model.
    vocab2, d_model2, B2, S2 = 512, 128, 2, 8
    table2 = jax.random.normal(k_tab2, (vocab2, d_model2), dtype=jnp.float32)
    x2 = jax.random.randint(k_ids2, (B2, S2), 0, vocab2, dtype=jnp.int32)

    out2 = jax.block_until_ready(
        embeddings_forward(x2, table2, force_gather=True))
    ref2 = jnp.take(table2, x2, axis=0) * math.sqrt(d_model2)
    assert out2.shape == (B2, S2, d_model2)
    assert jnp.allclose(out2, ref2, atol=1e-5, rtol=1e-5)

    print("KERNEL_OK")
</pallas_src>

<mosaic_0001>
module attributes {stable_mosaic.version = 11 : i64} {
  func.func @_onehot_kernel(%arg0: i32, %arg1: memref<16x1xi32, #tpu.memory_space<vmem>>, %arg2: memref<64x32xf32, #tpu.memory_space<vmem>>, %arg3: memref<16x32xf32, #tpu.memory_space<vmem>>) attributes {dimension_semantics = [#tpu.dimension_semantics<parallel>], iteration_bounds = array<i64: 1>, scalar_prefetch = 0 : i64, scratch_operands = 0 : i64, tpu.core_type = #tpu.core_type<tc>, window_params = [{transform_indices = @transform_0, window_bounds = array<i64: 16, 1>}, {pipeline_mode = #tpu.pipeline_mode<synchronous>, transform_indices = @transform_1, window_bounds = array<i64: 64, 32>}, {transform_indices = @transform_2, window_bounds = array<i64: 16, 32>}]} {
    %c0 = arith.constant 0 : index
    %c0_0 = arith.constant 0 : index
    %0 = vector.load %arg1[%c0, %c0_0] : memref<16x1xi32, #tpu.memory_space<vmem>>, vector<16x1xi32>
    %1 = tpu.iota {dimensions = array<i32: 1>} : vector<1x64xi32>
    %2 = vector.broadcast %0 : vector<16x1xi32> to vector<16x64xi32>
    %3 = vector.broadcast %1 : vector<1x64xi32> to vector<16x64xi32>
    %4 = arith.cmpi eq, %2, %3 : vector<16x64xi32>
    %5 = arith.extui %4 : vector<16x64xi1> to vector<16x64xi32>
    %6 = arith.sitofp %5 : vector<16x64xi32> to vector<16x64xf32>
    %c0_1 = arith.constant 0 : index
    %c0_2 = arith.constant 0 : index
    %7 = vector.load %arg2[%c0_1, %c0_2] : memref<64x32xf32, #tpu.memory_space<vmem>>, vector<64x32xf32>
    %cst = arith.constant dense<0.000000e+00> : vector<16x32xf32>
    %8 = tpu.matmul %6, %7, %cst {dimension_numbers = #tpu.dot_dimension_numbers<[1], [0], [0], [1], [0, 0, 1, 1], [], []>} : vector<16x64xf32>, vector<64x32xf32>, vector<16x32xf32> -> vector<16x32xf32>
    %cst_3 = arith.constant 5.65685415 : f32
    %9 = vector.broadcast %cst_3 : f32 to vector<16x32xf32>
    %10 = arith.mulf %8, %9 : vector<16x32xf32>
    %c0_4 = arith.constant 0 : index
    %c0_5 = arith.constant 0 : index
    %11 = vector.load %arg3[%c0_4, %c0_5] : memref<16x32xf32, #tpu.memory_space<vmem>>, vector<16x32xf32>
    tpu.vector_store %arg3[%c0_4, %c0_5], %10 {strides = array<i32>} : memref<16x32xf32, #tpu.memory_space<vmem>>, vector<16x32xf32>,
    return
  }
  func.func @transform_0(%arg0: i32) -> (i32, i32) {
    %c0_i32 = arith.constant 0 : i32
    %c0_i32_0 = arith.constant 0 : i32
    return %arg0, %c0_i32 : i32, i32
  }
  func.func @transform_1(%arg0: i32) -> (i32, i32) {
    %c0_i32 = arith.constant 0 : i32
    %c0_i32_0 = arith.constant 0 : i32
    %c0_i32_1 = arith.constant 0 : i32
    return %c0_i32, %c0_i32_0 : i32, i32
  }
  func.func @transform_2(%arg0: i32) -> (i32, i32) {
    %c0_i32 = arith.constant 0 : i32
    %c0_i32_0 = arith.constant 0 : i32
    return %arg0, %c0_i32 : i32, i32
  }
}

module attributes {stable_mosaic.version = 11 : i64} {
  func.func @_onehot_kernel(%arg0: i32, %arg1: memref<16x1xi32, #tpu.memory_space<vmem>>, %arg2: memref<64x32xf32, #tpu.memory_space<vmem>>, %arg3: memref<16x32xf32, #tpu.memory_space<vmem>>) attributes {dimension_semantics = [#tpu.dimension_semantics<parallel>], iteration_bounds = array<i64: 1>, scalar_prefetch = 0 : i64, scratch_operands = 0 : i64, tpu.core_type = #tpu.core_type<tc>, window_params = [{transform_indices = @transform_0, window_bounds = array<i64: 16, 1>}, {pipeline_mode = #tpu.pipeline_mode<synchronous>, transform_indices = @transform_1, window_bounds = array<i64: 64, 32>}, {transform_indices = @transform_2, window_bounds = array<i64: 16, 32>}]} {
    %c0 = arith.constant 0 : index
    %c0_0 = arith.constant 0 : index
    %0 = vector.load %arg1[%c0, %c0_0] : memref<16x1xi32, #tpu.memory_space<vmem>>, vector<16x1xi32>
    %1 = tpu.iota {dimensions = array<i32: 1>} : vector<1x64xi32>
    %2 = vector.broadcast %0 : vector<16x1xi32> to vector<16x64xi32>
    %3 = vector.broadcast %1 : vector<1x64xi32> to vector<16x64xi32>
    %4 = arith.cmpi eq, %2, %3 : vector<16x64xi32>
    %5 = arith.extui %4 : vector<16x64xi1> to vector<16x64xi32>
    %6 = arith.sitofp %5 : vector<16x64xi32> to vector<16x64xf32>
    %c0_1 = arith.constant 0 : index
    %c0_2 = arith.constant 0 : index
    %7 = vector.load %arg2[%c0_1, %c0_2] : memref<64x32xf32, #tpu.memory_space<vmem>>, vector<64x32xf32>
    %cst = arith.constant dense<0.000000e+00> : vector<16x32xf32>
    %8 = tpu.matmul %6, %7, %cst {dimension_numbers = #tpu.dot_dimension_numbers<[1], [0], [0], [1], [0, 0, 1, 1], [], []>} : vector<16x64xf32>, vector<64x32xf32>, vector<16x32xf32> -> vector<16x32xf32>
    %cst_3 = arith.constant 5.65685415 : f32
    %9 = vector.broadcast %cst_3 : f32 to vector<16x32xf32>
    %10 = arith.mulf %8, %9 : vector<16x32xf32>
    %c0_4 = arith.constant 0 : index
    %c0_5 = arith.constant 0 : index
    %11 = vector.load %arg3[%c0_4, %c0_5] : memref<16x32xf32, #tpu.memory_space<vmem>>, vector<16x32xf32>
    tpu.vector_store %arg3[%c0_4, %c0_5], %10 {strides = array<i32>} : memref<16x32xf32, #tpu.memory_space<vmem>>, vector<16x32xf32>,
    return
  }
  func.func @transform_0(%arg0: i32) -> (i32, i32) {
    %c0_i32 = arith.constant 0 : i32
    %c0_i32_0 = arith.constant 0 : i32
    return %arg0, %c0_i32 : i32, i32
  }
  func.func @transform_1(%arg0: i32) -> (i32, i32) {
    %c0_i32 = arith.constant 0 : i32
    %c0_i32_0 = arith.constant 0 : i32
    %c0_i32_1 = arith.constant 0 : i32
    return %c0_i32, %c0_i32_0 : i32, i32
  }
  func.func @transform_2(%arg0: i32) -> (i32, i32) {
    %c0_i32 = arith.constant 0 : i32
    %c0_i32_0 = arith.constant 0 : i32
    return %arg0, %c0_i32 : i32, i32
  }
}

</mosaic_0001>

<bundles_post_ra>
// kernel: tpu_custom_call.1
= control target key start
LH: loop header
LB: loop body
LE: loop exit
PB: predicated region body
PF: predicated region fallthrough
CT: control target
= control target key end

     0   :  { %v200_v2 = vmov 0   ;;  %s253_s0 = inlined_call_operand.vmem [shape: s32[16,1], index: 0, kind: input, shape index: {}]   ;;  %s254_s1 = inlined_call_operand.vmem [shape: f32[64,32], index: 1, kind: input, shape index: {}]   ;;  %s255_s2 = inlined_call_operand.hbm [shape: f32[16,32], index: 2, kind: output, shape index: {}]  }
   0x1   :  { %v12_v0 = vld [vmem:[%s253_s0] sm:$0xff]  ;;  %v35_v1 = vld [vmem:[%s254_s1 + $0x38] sm:$0xff]  ;;  %177 = vset.pattern.permute.xlu0 %v200_v2  ;;  %v34_v3 = vld [vmem:[%s254_s1 + $0x30] sm:$0xff] }
   0x2   :  { %153 = vmatprep.subr.mxu0 %v35_v1  ;;  %17 = vperm.xlu0 %177, %v12_v0   ;;  %v33_v4 = vld [vmem:[%s254_s1 + $0x28] sm:$0xff] }
   0x3   :  { %154 = vmatpush3.msra.mxu0 %v35_v1  ;;  %v13_v5 = vld [vmem:[%s253_s0 + $0x8] sm:$0xff] }
   0x4   :  { %155 = vmatprep.subr.mxu0 %v34_v3 }
   0x5   :  { %7 = vsyncpa [#allocation3], 0  ;;  %156 = vmatpush3.msra.mxu0 %v34_v3  ;;  %v32_v6 = vld [vmem:[%s254_s1 + $0x20] sm:$0xff]  ;;  %v31_v7 = vld [vmem:[%s254_s1 + $0x18] sm:$0xff]  ;;  %v14_v11 = vlaneseq  ;;  %vm36_vm0 = vcmask 523264   ;;  %v201_v14 = vmov 0.0  }
   0x6   :  { %157 = vmatprep.subr.mxu0 %v33_v4  ;;  %20 = vperm.xlu0 %177, %v13_v5   ;;  %v30_v8 = vld [vmem:[%s254_s1 + $0x10] sm:$0xff]  ;;  %v29_v9 = vld [vmem:[%s254_s1 + $0x8] sm:$0xff]  ;;  %v28_v10 = vld [vmem:[%s254_s1] sm:$0xff]  ;;  %s202_s28 = smov [#allocation2]   ;;  %vm120_vm3 = vcmask 261120  }
   0x7   :  { %158 = vmatpush3.msra.mxu0 %v33_v4  ;;  %v15_v12 = vand.u32 127, %v14_v11  ;;  %s128_s29 = sshll.u32 %s202_s28, 4  ;;  %s129_s29 = int_to_ptr.vmem [resolvable:$true] %s128_s29 }
   0x8   :  { %159 = vmatprep.subr.mxu0 %v32_v6  ;;  %s178_s1 = scalar_lea.vmem %s129_s29, 256  ;;  %p183_p1 = scmp.lt.s32.totalorder %s129_s29, %s129_s29 }
   0x9   :  { %160 = vmatpush3.msra.mxu0 %v32_v6  ;;  %p179_p0 = scmp.ne.s32.totalorder %s129_s29, %s178_s1  ;;  %p184_p2 = scmp.lt.s32.totalorder %s178_s1, %s178_s1 }
   0xa   :  { %161 = vmatprep.subr.mxu0 %v31_v7 }
   0xb   :  { %162 = vmatpush3.msra.mxu0 %v31_v7  ;;  %p185_p3 = por %p184_p2, %p183_p1 }
   0xc   :  { %163 = vmatprep.subr.mxu0 %v30_v8 }
   0xd   :  { %164 = vmatpush3.msra.mxu0 %v30_v8  ;;  %p186_p4 = pnand %p185_p3, %p179_p0 }
   0xe   :  { %165 = vmatprep.subr.mxu0 %v29_v9 }
   0xf   :  { %166 = vmatpush3.msra.mxu0 %v29_v9 }
  0x10   :  { %167 = vmatprep.subr.mxu0 %v28_v10 }
  0x11   :  { %168 = vmatpush3.msra.mxu0 %v28_v10 }
  0x7d   :  { %v18_v13 = vpop.permute.xlu0 %17 }
  0x7e   :  { %vm22_vm1 = vcmp.eq.s32.totalorder %v18_v13, %v15_v12 }
  0x7f   :  { %v139_v15 = vsel %vm22_vm1, 1.0, %v201_v14 }
  0x80   :  { %169 = vmatprep.mubr.msk.f32.mxu0 %vm36_vm0, %v139_v15 }
  0x81   :  { %v21_v16 = vpop.permute.xlu0 %20 }
  0x82   :  { %vm23_vm2 = vcmp.eq.s32.totalorder %v21_v16, %v15_v12 }
  0x83   :  { %v140_v17 = vsel %vm23_vm2, 1.0, %v201_v14 }
  0x84   :  { %170 = vmatmul.mubr.msk.f32.vlgmr.msra.gmra.mxu0 %vm36_vm0, %v140_v17 }
 0x144   :  { %v171_v18 = vpop.f32.mrf.mxu0 }
 0x145   :  { %v119_v19 = vmul.f32 5.656854, %v171_v18 }
 0x146   :  { %v109_v20 = vpop.f32.mrf.mxu0 }
 0x147   :  { %122 = vst.msk [vmem:[#allocation2 + $0x8] sm:$0xff] %vm120_vm3, %v119_v19  ;;  %v118_v21 = vmul.f32 5.656854, %v109_v20 }
 0x149   :  { %121 = vst.msk [vmem:[#allocation2] sm:$0xff] %vm120_vm3, %v118_v21 }
 0x14a   :  { %189 = shalt.err (!%p186_p4)
}
 0x14b   :  { %s203_s30 = smov 128   ;;  %s204_s3 = smov 8  }
 0x14c   :  { %134 = dma.vmem_to_hbm [thread:$0]  %s129_s29, 256, %s255_s2, [#allocation3], %s203_s30, %s203_s30, %s204_s3  }
 0x14d   :  { %198 = dma.done.wait [#allocation3], 256  }
 0x14e   :  { %199 = vsyncadd [#allocation3], 4294967040 }
 0x14f   :  { %138 = vsyncpa [#allocation3], 1 }

// kernel: tpu_custom_call.1
= control target key start
LH: loop header
LB: loop body
LE: loop exit
PB: predicated region body
PF: predicated region fallthrough
CT: control target
= control target key end

     0   :  { %v200_v2 = vmov 0   ;;  %s253_s0 = inlined_call_operand.vmem [shape: s32[16,1], index: 0, kind: input, shape index: {}]   ;;  %s254_s1 = inlined_call_operand.vmem [shape: f32[64,32], index: 1, kind: input, shape index: {}]   ;;  %s255_s2 = inlined_call_operand.hbm [shape: f32[16,32], index: 2, kind: output, shape index: {}]  }
   0x1   :  { %v12_v0 = vld [vmem:[%s253_s0] sm:$0xff]  ;;  %v35_v1 = vld [vmem:[%s254_s1 + $0x38] sm:$0xff]  ;;  %177 = vset.pattern.permute.xlu0 %v200_v2  ;;  %v34_v3 = vld [vmem:[%s254_s1 + $0x30] sm:$0xff] }
   0x2   :  { %153 = vmatprep.subr.mxu0 %v35_v1  ;;  %17 = vperm.xlu0 %177, %v12_v0   ;;  %v33_v4 = vld [vmem:[%s254_s1 + $0x28] sm:$0xff] }
   0x3   :  { %154 = vmatpush3.msra.mxu0 %v35_v1  ;;  %v13_v5 = vld [vmem:[%s253_s0 + $0x8] sm:$0xff] }
   0x4   :  { %155 = vmatprep.subr.mxu0 %v34_v3 }
   0x5   :  { %7 = vsyncpa [#allocation3], 0  ;;  %156 = vmatpush3.msra.mxu0 %v34_v3  ;;  %v32_v6 = vld [vmem:[%s254_s1 + $0x20] sm:$0xff]  ;;  %v31_v7 = vld [vmem:[%s254_s1 + $0x18] sm:$0xff]  ;;  %v14_v11 = vlaneseq  ;;  %vm36_vm0 = vcmask 523264   ;;  %v201_v14 = vmov 0.0  }
   0x6   :  { %157 = vmatprep.subr.mxu0 %v33_v4  ;;  %20 = vperm.xlu0 %177, %v13_v5   ;;  %v30_v8 = vld [vmem:[%s254_s1 + $0x10] sm:$0xff]  ;;  %v29_v9 = vld [vmem:[%s254_s1 + $0x8] sm:$0xff]  ;;  %v28_v10 = vld [vmem:[%s254_s1] sm:$0xff]  ;;  %s202_s28 = smov [#allocation2]   ;;  %vm120_vm3 = vcmask 261120  }
   0x7   :  { %158 = vmatpush3.msra.mxu0 %v33_v4  ;;  %v15_v12 = vand.u32 127, %v14_v11  ;;  %s128_s29 = sshll.u32 %s202_s28, 4  ;;  %s129_s29 = int_to_ptr.vmem [resolvable:$true] %s128_s29 }
   0x8   :  { %159 = vmatprep.subr.mxu0 %v32_v6  ;;  %s178_s1 = scalar_lea.vmem %s129_s29, 256  ;;  %p183_p1 = scmp.lt.s32.totalorder %s129_s29, %s129_s29 }
   0x9   :  { %160 = vmatpush3.msra.mxu0 %v32_v6  ;;  %p179_p0 = scmp.ne.s32.totalorder %s129_s29, %s178_s1  ;;  %p184_p2 = scmp.lt.s32.totalorder %s178_s1, %s178_s1 }
   0xa   :  { %161 = vmatprep.subr.mxu0 %v31_v7 }
   0xb   :  { %162 = vmatpush3.msra.mxu0 %v31_v7  ;;  %p185_p3 = por %p184_p2, %p183_p1 }
   0xc   :  { %163 = vmatprep.subr.mxu0 %v30_v8 }
   0xd   :  { %164 = vmatpush3.msra.mxu0 %v30_v8  ;;  %p186_p4 = pnand %p185_p3, %p179_p0 }
   0xe   :  { %165 = vmatprep.subr.mxu0 %v29_v9 }
   0xf   :  { %166 = vmatpush3.msra.mxu0 %v29_v9 }
  0x10   :  { %167 = vmatprep.subr.mxu0 %v28_v10 }
  0x11   :  { %168 = vmatpush3.msra.mxu0 %v28_v10 }
  0x7d   :  { %v18_v13 = vpop.permute.xlu0 %17 }
  0x7e   :  { %vm22_vm1 = vcmp.eq.s32.totalorder %v18_v13, %v15_v12 }
  0x7f   :  { %v139_v15 = vsel %vm22_vm1, 1.0, %v201_v14 }
  0x80   :  { %169 = vmatprep.mubr.msk.f32.mxu0 %vm36_vm0, %v139_v15 }
  0x81   :  { %v21_v16 = vpop.permute.xlu0 %20 }
  0x82   :  { %vm23_vm2 = vcmp.eq.s32.totalorder %v21_v16, %v15_v12 }
  0x83   :  { %v140_v17 = vsel %vm23_vm2, 1.0, %v201_v14 }
  0x84   :  { %170 = vmatmul.mubr.msk.f32.vlgmr.msra.gmra.mxu0 %vm36_vm0, %v140_v17 }
 0x144   :  { %v171_v18 = vpop.f32.mrf.mxu0 }
 0x145   :  { %v119_v19 = vmul.f32 5.656854, %v171_v18 }
 0x146   :  { %v109_v20 = vpop.f32.mrf.mxu0 }
 0x147   :  { %122 = vst.msk [vmem:[#allocation2 + $0x8] sm:$0xff] %vm120_vm3, %v119_v19  ;;  %v118_v21 = vmul.f32 5.656854, %v109_v20 }
 0x149   :  { %121 = vst.msk [vmem:[#allocation2] sm:$0xff] %vm120_vm3, %v118_v21 }
 0x14a   :  { %189 = shalt.err (!%p186_p4)
}
 0x14b   :  { %s203_s30 = smov 128   ;;  %s204_s3 = smov 8  }
 0x14c   :  { %134 = dma.vmem_to_hbm [thread:$0]  %s129_s29, 256, %s255_s2, [#allocation3], %s203_s30, %s203_s30, %s204_s3  }
 0x14d   :  { %198 = dma.done.wait [#allocation3], 256  }
 0x14e   :  { %199 = vsyncadd [#allocation3], 4294967040 }
 0x14f   :  { %138 = vsyncpa [#allocation3], 1 }

</bundles_post_ra>
